<compile_context>
chip_gen: v7x
topology: tpu7x:2x2x1
jax: 0.10.0
libtpu: 0.0.40
codegen_flags: <defaults>
</compile_context>

<pallas_src>
import functools
import types

import jax
import jax.numpy as jnp
from jax.experimental import pallas as pl
from jax.experimental.pallas import tpu as pltpu


_VMEM_LIMIT = 32 * 1024 * 1024  # explicit scoped-VMEM budget; <= physical on v5e/v6e/v7x


# ------------------------------ small helpers --------------------------------

def _round_up(x, m):
    return (x + m - 1) // m * m


def _pick_tile(dim, unit, cap):
    """Smallest multiple of `unit` covering `dim`, capped (cap is a multiple of unit)."""
    return min(_round_up(max(dim, 1), unit), cap)


def _pad2d(x, bm, bn, value=0):
    B, L = x.shape
    Bp, Lp = _round_up(B, bm), _round_up(L, bn)
    if (Bp, Lp) != (B, L):
        x = jnp.pad(x, ((0, Bp - B), (0, Lp - L)), constant_values=value)
    return x, Bp, Lp


# ----------------------------- Pallas kernels --------------------------------

def _word_type_trans_kernel(wt_ref, out_ref):
    wt = wt_ref[...]
    mask_ori = ((wt == 1) | (wt == 2) | (wt == 3)).astype(jnp.int32)
    mask_nei = (wt == 4).astype(jnp.int32) * 2
    out_ref[...] = mask_ori + mask_nei


def word_type_trans(word_type, *, row_cap=512, col_cap=1024):
    """word_type: [B, L] int32 -> [B, L] int32  (1/2/3 -> 1, 4 -> 2, everything else -> 0)."""
    B, L = word_type.shape
    bm = _pick_tile(B, 8, row_cap)
    bn = _pick_tile(L, 128, col_cap)
    x, Bp, Lp = _pad2d(word_type.astype(jnp.int32), bm, bn)
    out = pl.pallas_call(
        _word_type_trans_kernel,
        out_shape=jax.ShapeDtypeStruct((Bp, Lp), jnp.int32),
        grid=(Bp // bm, Lp // bn),
        in_specs=[pl.BlockSpec((bm, bn), lambda i, j: (i, j))],
        out_specs=pl.BlockSpec((bm, bn), lambda i, j: (i, j)),
        compiler_params=pltpu.CompilerParams(
            dimension_semantics=("parallel", "parallel"),
            vmem_limit_bytes=_VMEM_LIMIT),
    )(x)
    return out[:B, :L]


def _mask_kernel(idx_ref, mask_pad_ref, mask_score_ref):
    nz = idx_ref[...] != 0
    mask_pad_ref[...] = nz.astype(jnp.float32)
    # mask_trans(): 0. where real token, -inf where pad
    mask_score_ref[...] = jnp.where(nz, jnp.float32(0.0), jnp.float32(-jnp.inf))


def mask_stats(idx, *, row_cap=512, col_cap=1024):
    """idx: [B, L] int32 padded with 0.

    Returns
      mask_pad   [B, L] f32  == idx.ne(0).float()
      mask_score [B, L] f32  == mask_trans(idx.ne(0).float())   (0. / -inf)
      num        [B, 1] f32  == number of real tokens per row (derived in the wrapper,
                                avoiding a lane-sparse [B,1] kernel output)
    """
    B, L = idx.shape
    bm = _pick_tile(B, 8, row_cap)
    bn = _pick_tile(L, 128, col_cap)
    x, Bp, Lp = _pad2d(idx.astype(jnp.int32), bm, bn)
    mask_pad, mask_score = pl.pallas_call(
        _mask_kernel,
        out_shape=(
            jax.ShapeDtypeStruct((Bp, Lp), jnp.float32),
            jax.ShapeDtypeStruct((Bp, Lp), jnp.float32),
        ),
        grid=(Bp // bm, Lp // bn),
        in_specs=[pl.BlockSpec((bm, bn), lambda i, j: (i, j))],
        out_specs=(
            pl.BlockSpec((bm, bn), lambda i, j: (i, j)),
            pl.BlockSpec((bm, bn), lambda i, j: (i, j)),
        ),
        compiler_params=pltpu.CompilerParams(
            dimension_semantics=("parallel", "parallel"),
            vmem_limit_bytes=_VMEM_LIMIT),
    )(x)
    mask_pad = mask_pad[:B, :L]
    mask_score = mask_score[:B, :L]
    num = jnp.sum(mask_pad, axis=1, keepdims=True)
    return mask_pad, mask_score, num


def _gather_rows_kernel(ids_ref, table_hbm, out_ref, buf, sem, *, rows, vocab):
    """Gather `rows` embedding rows for grid step i via per-row HBM->VMEM DMA."""
    base = pl.program_id(0) * rows
    # Issue all row DMAs (they overlap), then wait and commit the block.
    for r in range(rows):                                   # rows is small & static
        idx = jnp.clip(ids_ref[base + r], 0, vocab - 1)     # clamp OOB ids (torch would raise)
        pltpu.make_async_copy(table_hbm.at[idx], buf.at[r], sem.at[r]).start()
    for r in range(rows):
        pltpu.make_async_copy(table_hbm.at[0], buf.at[r], sem.at[r]).wait()
    out_ref[...] = buf[...]


def embedding_lookup(ids, table, *, rows_per_step=8):
    """Gather rows of table [V, E] at ids [B, N] via DMA; table never leaves HBM whole."""
    B, N = ids.shape
    V, E = table.shape
    M = B * N
    Mp = _round_up(M, rows_per_step)
    ids_flat = jnp.pad(ids.reshape(M).astype(jnp.int32), (0, Mp - M))
    out = pl.pallas_call(
        functools.partial(_gather_rows_kernel, rows=rows_per_step, vocab=V),
        out_shape=jax.ShapeDtypeStruct((Mp, E), table.dtype),
        grid_spec=pltpu.PrefetchScalarGridSpec(
            num_scalar_prefetch=1,                       # ids -> SMEM
            grid=(Mp // rows_per_step,),
            in_specs=[pl.BlockSpec(memory_space=pl.ANY)],  # embedding table stays in HBM
            out_specs=pl.BlockSpec((rows_per_step, E), lambda i, ids: (i, 0)),
            scratch_shapes=[
                pltpu.VMEM((rows_per_step, E), table.dtype),
                pltpu.SemaphoreType.DMA((rows_per_step,)),
            ],
        ),
        compiler_params=pltpu.CompilerParams(
            dimension_semantics=("parallel",),           # independent row blocks -> megacore
            vmem_limit_bytes=_VMEM_LIMIT),
    )(ids_flat, table)
    return out[:M].reshape(B, N, E)


# ------------------------------- glue helpers --------------------------------

def pad_sequence_jnp(seqs, pad_value=0):
    max_len = max(int(s.shape[0]) for s in seqs)
    return jnp.stack(
        [jnp.pad(s, (0, max_len - int(s.shape[0])), constant_values=pad_value)
         for s in seqs], axis=0)


def pad_matrix_jnp(mats):
    """Equivalent of pad_martix(): zero-pad 2-D matrices to a common shape and stack."""
    max_l = max(int(m.shape[0]) for m in mats)
    max_w = max(int(m.shape[1]) for m in mats)
    return jnp.stack(
        [jnp.pad(m, ((0, max_l - int(m.shape[0])), (0, max_w - int(m.shape[1]))))
         for m in mats], axis=0)


def get_key(item):
    return item[1]


def sort_list(lst, index):
    pairs = sorted(zip(lst, index), key=get_key)
    return [p[0] for p in pairs]


# ------------------------------- module --------------------------------------

class Graph2SeqRLPallas:
    """Pallas/JAX port of graph2seq_rl.forward (sample==False path is exact; the
    deterministic preprocessing of the sample==True path is in sample_preprocess)."""

    def __init__(self, config, vocab_size, key):
        self.config = config
        self.vocab_size = vocab_size
        k1, k2 = jax.random.split(key)
        # deterministic synthetic parameters (nn.Embedding tables)
        self.embedding = 0.02 * jax.random.normal(
            k1, (vocab_size, config["emb_size"]), jnp.float32)
        self.word_type_emb = 0.02 * jax.random.normal(
            k2, (config["type_num_sam"], config["emb_size"]), jnp.float32)
        # TODO(synk): models.Graph_encoder_sample_weight (GCN-LSTM graph encoder) and
        # models.rl_sample (RL neighbour sampler) are external modules with no source in
        # this file; their compute cannot be reproduced, so the sample==True branch stops
        # at the preprocessing stage.

    # -- partition examples by neighbour count (same predicate as the reference loop) --
    def _partition(self, batch):
        sample_num = self.config["sample_num"]
        idx_s, idx_no = [], []
        for i in range(len(batch.sub_node_idx)):
            if int(batch.neibour_node_idx[i].shape[0]) < sample_num:
                idx_no.append(i)
            else:
                idx_s.append(i)
        return idx_s, idx_no

    def sample_preprocess(self, batch):
        """Pallas implementation of the deterministic compute of the sample==True branch
        (everything up to, but excluding, the external encoder / rl_sample calls)."""
        idx_s, _ = self._partition(batch)
        sub_node_idx_s = [batch.sub_node_idx[i] for i in idx_s]
        neibour_s = [batch.neibour_node_idx[i] for i in idx_s]
        sub_nei_mask_s = [batch.sub_neibour_mask[i] for i in idx_s]

        sub_pad = pad_sequence_jnp(sub_node_idx_s)              # [Bs, Lmax]
        mask_pad2d, mask_score, sub_num = mask_stats(sub_pad)   # Pallas (fused masks)
        mask_pad = mask_pad2d[..., None]                        # == .unsqueeze(-1)

        nei_pad = pad_sequence_jnp(neibour_s)                   # [Bs, Nmax]
        _, nei_pad_mask, nei_num_f = mask_stats(nei_pad)        # Pallas (fused masks)
        nei_num = nei_num_f.astype(jnp.int32)                   # sum of a bool mask (long)

        neibour_node_emb = embedding_lookup(nei_pad, self.embedding)   # Pallas DMA gather
        sub_neibour_mask = pad_matrix_jnp(sub_nei_mask_s)

        # TODO(synk): sub_x, sub_graph = self.encoder(...) and
        # sample_ids, sample_prob = self.rl_sample(...) require external modules;
        # the downstream sampled-adjacency assembly is therefore not implemented.
        return dict(
            sub_node_idx_pad=sub_pad, mask_pad=mask_pad, mask_score=mask_score,
            sub_num=sub_num, nei_pad_mask=nei_pad_mask, nei_num=nei_num,
            neibour_node_emb=neibour_node_emb, sub_neibour_mask=sub_neibour_mask,
        )

    def forward(self, batch, sample=False):
        if sample:
            raise NotImplementedError(
                "sample=True requires external encoder/rl_sample modules; see "
                "sample_preprocess() for the Pallas-implemented portion.")

        idx_s, idx_no = self._partition(batch)
        index = idx_s + idx_no
        sel = lambda lst: [lst[i] for i in idx_s] + [lst[i] for i in idx_no]

        # sample == False branch of the reference forward
        word_type_batch = sel(batch.word_type_sub)
        sample_node_idx_batch = sel(batch.sub_node_idx)
        sample_adj_batch = sel(batch.sub_adj)
        sample_adj_weight_batch = sel(batch.sub_adj_weight)
        sample_prob_batch = jnp.ones((len(sample_node_idx_batch),), jnp.float32)
        sub_node_idx = sel(batch.sub_node_idx)
        tgt = sel(batch.ads)
        query = sel(batch.query)

        # restore original batch order (sort_list / index_select in the reference)
        sample_node_idx_batch = sort_list(sample_node_idx_batch, index)
        sample_adj_batch = sort_list(sample_adj_batch, index)
        sample_adj_weight_batch = sort_list(sample_adj_weight_batch, index)
        sample_prob_batch = sample_prob_batch[jnp.asarray(index, jnp.int32)]
        tgt = sort_list(tgt, index)
        word_type_batch = sort_list(word_type_batch, index)
        sub_node_idx = sort_list(sub_node_idx, index)
        query = sort_list(query, index)

        tgt = jnp.stack(tgt, axis=0)
        word_type_padded = pad_sequence_jnp(word_type_batch)    # pad_sequence(batch_first)
        word_type_padded = word_type_trans(word_type_padded)    # Pallas kernel
        word_type_batch = list(word_type_padded)                # == .unbind(0)

        return (sample_node_idx_batch, sample_adj_batch, sample_adj_weight_batch,
                sample_prob_batch, tgt, word_type_batch, query, sub_node_idx)


# --------------------------------- demo --------------------------------------

if __name__ == "__main__":
    key = jax.random.PRNGKey(0)
    config = dict(emb_size=32, type_num_sam=5, sample_num=3)
    vocab_size = 32

    kparam, kdata = jax.random.split(key)
    model = Graph2SeqRLPallas(config, vocab_size, kparam)

    # small ragged batch consistent with the module's forward
    sub_lens = [5, 7, 4, 6]        # per-example sub-graph node counts
    nei_lens = [2, 6, 5, 1]        # per-example neighbour counts (2 above / 2 below sample_num)
    tgt_len, query_len = 8, 6

    sub_node_idx, extend_node_idx, neibour_node_idx = [], [], []
    sub_adj, sub_adj_weight, extend_adj = [], [], []
    word_type, word_type_sub, sub_neibour_mask = [], [], []
    ads, query = [], []

    k = kdata
    for sl, nl in zip(sub_lens, nei_lens):
        k, *ks = jax.random.split(k, 10)
        sub = jax.random.randint(ks[0], (sl,), 1, vocab_size, dtype=jnp.int32)
        nei = jax.random.randint(ks[1], (nl,), 1, vocab_size, dtype=jnp.int32)
        ext = jnp.concatenate([sub, nei], axis=0)
        sub_node_idx.append(sub)
        neibour_node_idx.append(nei)
        extend_node_idx.append(ext)
        n_edges = 2 * sl
        sub_adj.append(jax.random.randint(ks[2], (2, n_edges), 0, sl, dtype=jnp.int32))
        sub_adj_weight.append(jnp.ones((n_edges,), jnp.float32))
        el = sl + nl
        extend_adj.append((jax.random.uniform(ks[3], (el, el)) > 0.5).astype(jnp.float32))
        word_type.append(jax.random.randint(ks[4], (el,), 1, 5, dtype=jnp.int32))
        word_type_sub.append(jax.random.randint(ks[5], (sl,), 1, 5, dtype=jnp.int32))
        sub_neibour_mask.append((jax.random.uniform(ks[6], (sl, nl)) > 0.5).astype(jnp.float32))
        ads.append(jax.random.randint(ks[7], (tgt_len,), 1, vocab_size, dtype=jnp.int32))
        query.append(jax.random.randint(ks[8], (query_len,), 1, vocab_size, dtype=jnp.int32))

    batch = types.SimpleNamespace(
        sub_node_idx=sub_node_idx, extend_node_idx=extend_node_idx,
        neibour_node_idx=neibour_node_idx, sub_adj=sub_adj,
        sub_adj_weight=sub_adj_weight, extend_adj=extend_adj,
        word_type=word_type, ads=ads, sub_neibour_mask=sub_neibour_mask,
        word_type_sub=word_type_sub, query=query)

    # full forward (sample=False path, exact semantics) — uses the word_type_trans kernel
    outputs = model.forward(batch, sample=False)
    # deterministic preprocessing of the sample=True path — mask/count/embedding kernels
    preproc = model.sample_preprocess(batch)

    jax.tree_util.tree_map(jax.block_until_ready, outputs)
    jax.tree_util.tree_map(jax.block_until_ready, preproc)
    print("KERNEL_OK")
</pallas_src>

<mosaic_0001>
module attributes {stable_mosaic.version = 11 : i64} {
  func.func @_word_type_trans_kernel(%arg0: i32, %arg1: i32, %arg2: memref<8x128xi32, #tpu.memory_space<vmem>>, %arg3: memref<8x128xi32, #tpu.memory_space<vmem>>) attributes {dimension_semantics = [#tpu.dimension_semantics<parallel>, #tpu.dimension_semantics<parallel>], iteration_bounds = array<i64: 1, 1>, scalar_prefetch = 0 : i64, scratch_operands = 0 : i64, tpu.core_type = #tpu.core_type<tc>, window_params = [{transform_indices = @transform_0, window_bounds = array<i64: 8, 128>}, {transform_indices = @transform_1, window_bounds = array<i64: 8, 128>}]} {
    %c0 = arith.constant 0 : index
    %c0_0 = arith.constant 0 : index
    %0 = vector.load %arg2[%c0, %c0_0] : memref<8x128xi32, #tpu.memory_space<vmem>>, vector<8x128xi32>
    %c1_i32 = arith.constant 1 : i32
    %1 = vector.broadcast %c1_i32 : i32 to vector<8x128xi32>
    %2 = arith.cmpi eq, %0, %1 : vector<8x128xi32>
    %c2_i32 = arith.constant 2 : i32
    %3 = vector.broadcast %c2_i32 : i32 to vector<8x128xi32>
    %4 = arith.cmpi eq, %0, %3 : vector<8x128xi32>
    %5 = arith.ori %2, %4 : vector<8x128xi1>
    %c3_i32 = arith.constant 3 : i32
    %6 = vector.broadcast %c3_i32 : i32 to vector<8x128xi32>
    %7 = arith.cmpi eq, %0, %6 : vector<8x128xi32>
    %8 = arith.ori %5, %7 : vector<8x128xi1>
    %9 = arith.extui %8 : vector<8x128xi1> to vector<8x128xi32>
    %c4_i32 = arith.constant 4 : i32
    %10 = vector.broadcast %c4_i32 : i32 to vector<8x128xi32>
    %11 = arith.cmpi eq, %0, %10 : vector<8x128xi32>
    %12 = arith.extui %11 : vector<8x128xi1> to vector<8x128xi32>
    %c2_i32_1 = arith.constant 2 : i32
    %13 = vector.broadcast %c2_i32_1 : i32 to vector<8x128xi32>
    %14 = arith.muli %12, %13 : vector<8x128xi32>
    %15 = arith.addi %9, %14 : vector<8x128xi32>
    %c0_2 = arith.constant 0 : index
    %c0_3 = arith.constant 0 : index
    %16 = vector.load %arg3[%c0_2, %c0_3] : memref<8x128xi32, #tpu.memory_space<vmem>>, vector<8x128xi32>
    tpu.vector_store %arg3[%c0_2, %c0_3], %15 {strides = array<i32>} : memref<8x128xi32, #tpu.memory_space<vmem>>, vector<8x128xi32>,
    return
  }
  func.func @transform_0(%arg0: i32, %arg1: i32) -> (i32, i32) {
    %c0_i32 = arith.constant 0 : i32
    return %arg0, %arg1 : i32, i32
  }
  func.func @transform_1(%arg0: i32, %arg1: i32) -> (i32, i32) {
    %c0_i32 = arith.constant 0 : i32
    return %arg0, %arg1 : i32, i32
  }
}

</mosaic_0001>

<bundles_post_ra>
// kernel: tpu_custom_call.1
= control target key start
LH: loop header
LB: loop body
LE: loop exit
PB: predicated region body
PF: predicated region fallthrough
CT: control target
= control target key end

     0   :  { %6 = vsyncpa [#allocation3], 0  ;;  %s136_s0 = inlined_call_operand.hbm [shape: s32[8,128], index: 0, kind: input, shape index: {}]   ;;  %s137_s1 = inlined_call_operand.hbm [shape: s32[8,128], index: 1, kind: output, shape index: {}]  }
   0x1   :  { %7 = vsyncpa [#allocation4], 0  ;;  %s99_s6 = smov [#allocation2]   ;;  %s51_s10 = scalar_lea.hbm %s136_s0, 128 }
   0x2   :  { %s14_s7 = sshll.u32 %s99_s6, 4  ;;  %p52_p0 = scmp.ne.s32.totalorder %s136_s0, %s51_s10  ;;  %s15_s7 = int_to_ptr.vmem [resolvable:$true] %s14_s7 }
   0x3   :  { %p55_p1 = scmp.lt.u32.totalorder %s51_s10, %s136_s0 }
   0x5   :  { %p57_p2 = pnand %p55_p1, %p52_p0 }
   0x7   :  { %60 = shalt.err (!%p57_p2)
}
   0x8   :  { %s61_s15 = scalar_lea.vmem %s15_s7, 128  ;;  %p66_p4 = scmp.lt.s32.totalorder %s15_s7, %s15_s7 }
   0x9   :  { %p62_p3 = scmp.ne.s32.totalorder %s15_s7, %s61_s15  ;;  %p67_p5 = scmp.lt.s32.totalorder %s61_s15, %s61_s15 }
   0xb   :  { %p68_p6 = por %p67_p5, %p66_p4 }
   0xd   :  { %p69_p7 = pnand %p68_p6, %p62_p3 }
   0xf   :  { %72 = shalt.err (!%p69_p7)
}
  0x10   :  { %17 = dma.hbm_to_vmem [thread:$0]  %s136_s0, 128, %s15_s7, [#allocation3]  }
  0x11   :  { %95 = dma.done.wait [#allocation3], 128  }
  0x12   :  { %96 = vsyncadd [#allocation3], 4294967168  ;;  %v21_v0 = vld [vmem:[#allocation2] sm:$0xff]  ;;  %v100_v1 = vmov 0   ;;  %s101_s18 = smov [#allocation5]  }
  0x13   :  { %vm22_vm0 = vcmp.eq.s32.totalorder %v21_v0, 1  ;;  %vm23_vm1 = vcmp.eq.s32.totalorder %v21_v0, 2  ;;  %vm25_vm2 = vcmp.eq.s32.totalorder %v21_v0, 3  ;;  %vm28_vm3 = vcmp.eq.s32.totalorder %v21_v0, 4  ;;  %s39_s19 = sshll.u32 %s101_s18, 4  ;;  %s40_s19 = int_to_ptr.vmem [resolvable:$true] %s39_s19 }
  0x14   :  { %vm24_vm4 = vmor %vm22_vm0, %vm23_vm1  ;;  %v29_v2 = vsel %vm28_vm3, 1, %v100_v1  ;;  %s73_s20 = scalar_lea.vmem %s40_s19, 128  ;;  %p78_p9 = scmp.lt.s32.totalorder %s40_s19, %s40_s19 }
  0x15   :  { %vm26_vm5 = vmor %vm24_vm4, %vm25_vm2  ;;  %v30_v3 = vmul.u32 2, %v29_v2  ;;  %p74_p8 = scmp.ne.s32.totalorder %s40_s19, %s73_s20  ;;  %p79_p10 = scmp.lt.s32.totalorder %s73_s20, %s73_s20 }
  0x16   :  { %v27_v4 = vsel %vm26_vm5, 1, %v100_v1 }
  0x17   :  { %v31_v5 = vadd.s32 %v30_v3, %v27_v4  ;;  %p80_p11 = por %p79_p10, %p78_p9 }
  0x19   :  { %32 = vst [vmem:[#allocation5] sm:$0xff] %v31_v5  ;;  %p81_p12 = pnand %p80_p11, %p74_p8 }
  0x1b   :  { %84 = shalt.err (!%p81_p12)
}
  0x1c   :  { %s85_s22 = scalar_lea.hbm %s137_s1, 128 }
  0x1d   :  { %p86_p13 = scmp.ne.s32.totalorder %s137_s1, %s85_s22  ;;  %p89_p0 = scmp.lt.u32.totalorder %s85_s22, %s137_s1 }
  0x1f   :  { %p91_p1 = pnand %p89_p0, %p86_p13 }
  0x21   :  { %94 = shalt.err (!%p91_p1)
}
  0x22   :  { %42 = dma.vmem_to_hbm [thread:$0]  %s40_s19, 128, %s137_s1, [#allocation4]  }
  0x23   :  { %97 = dma.done.wait [#allocation4], 128  }
  0x24   :  { %98 = vsyncadd [#allocation4], 4294967168 }
  0x25   :  { %46 = vsyncpa [#allocation3], 1 }
  0x26   :  { %47 = vsyncpa [#allocation4], 1 }

</bundles_post_ra>
